<compile_context>
chip_gen: v6e
topology: v6e:2x2x1
jax: 0.10.0
libtpu: 0.0.40
codegen_flags: <defaults>
</compile_context>

<pallas_src>
import jax
import jax.numpy as jnp
from jax.experimental import pallas as pl
from jax.experimental.pallas import tpu as pltpu


def _make_mlp_kernel(n_layers, input_skips):
    skips = frozenset(input_skips)

    def kernel(*refs):
        # refs = (x_ref, z_ref, w0, b0, w1, b1, ..., out_ref)
        x_ref, z_ref = refs[0], refs[1]
        out_ref = refs[-1]
        wb = refs[2:-1]

        y = x_ref[...]                       # (TN, input_dim)  f32
        z = z_ref[...]                       # (TN, skip_dim)   f32

        for li in range(n_layers):
            w_ref = wb[2 * li]               # (dimin_li, hidden)
            b = wb[2 * li + 1][...]          # (1, hidden)
            if li in skips:
                # cat((y, z), -1) @ W  ==  y @ W[:dy] + z @ W[dy:]
                dy = y.shape[-1]
                acc = jnp.dot(y, w_ref[:dy, :],
                              preferred_element_type=jnp.float32)
                acc = acc + jnp.dot(z, w_ref[dy:, :],
                                    preferred_element_type=jnp.float32)
            else:
                acc = jnp.dot(y, w_ref[...],
                              preferred_element_type=jnp.float32)
            y = jnp.maximum(acc + b, 0.0)    # Linear -> ReLU

        out_ref[...] = y.astype(out_ref.dtype)

    return kernel


def mlp_with_input_skips(x, z, weights, biases, input_skips, *, tile=256):
    """x: (..., input_dim), z: (..., skip_dim); weights[i]: (dimin_i, hidden),
    biases[i]: (hidden,).  Returns (..., hidden) float32."""
    lead = x.shape[:-1]
    input_dim = x.shape[-1]
    skip_dim = z.shape[-1]
    hidden_dim = weights[0].shape[1]
    n_layers = len(weights)

    xf = x.reshape(-1, input_dim).astype(jnp.float32)
    zf = z.reshape(-1, skip_dim).astype(jnp.float32)
    n = xf.shape[0]

    # Pad rows to a tile multiple instead of asserting divisibility.
    n_pad = pl.cdiv(n, tile) * tile
    if n_pad != n:
        pad = n_pad - n
        xf = jnp.pad(xf, ((0, pad), (0, 0)))
        zf = jnp.pad(zf, ((0, pad), (0, 0)))

    w_args = [w.astype(jnp.float32) for w in weights]
    b_args = [b.reshape(1, -1).astype(jnp.float32) for b in biases]

    in_specs = [
        pl.BlockSpec((tile, input_dim), lambda i: (i, 0)),   # x row tile
        pl.BlockSpec((tile, skip_dim), lambda i: (i, 0)),    # z row tile
    ]
    wb_flat = []
    for w, b in zip(w_args, b_args):
        # Full-array blocks with constant index_map -> resident in VMEM,
        # no re-DMA across grid steps.
        in_specs.append(pl.BlockSpec(w.shape, lambda i: (0, 0)))
        in_specs.append(pl.BlockSpec(b.shape, lambda i: (0, 0)))
        wb_flat.extend([w, b])

    out = pl.pallas_call(
        _make_mlp_kernel(n_layers, input_skips),
        out_shape=jax.ShapeDtypeStruct((n_pad, hidden_dim), jnp.float32),
        grid=(n_pad // tile,),
        in_specs=in_specs,
        out_specs=pl.BlockSpec((tile, hidden_dim), lambda i: (i, 0)),
        compiler_params=pltpu.CompilerParams(
            dimension_semantics=("parallel",)   # megacore / v7x 2-TC sharding
        ),
    )(xf, zf, *wb_flat)

    return out[:n].reshape(*lead, hidden_dim)


def mlp_with_input_skips_ref(x, z, weights, biases, input_skips):
    """Pure-JAX reference matching the PyTorch forward exactly."""
    skips = set(input_skips)
    y = x.astype(jnp.float32)
    zf = z.astype(jnp.float32)
    for li, (w, b) in enumerate(zip(weights, biases)):
        if li in skips:
            y = jnp.concatenate([y, zf], axis=-1)
        y = jnp.maximum(jnp.dot(y, w) + b, 0.0)
    return y


if __name__ == "__main__":
    key = jax.random.PRNGKey(0)

    # Small NeRF-style config.
    n_layers = 4
    input_dim = 32
    skip_dim = 32
    hidden_dim = 64
    input_skips = (2,)
    n_rays, n_samples = 8, 64          # N = 512 flattened points

    keys = jax.random.split(key, 2 + 2 * n_layers)
    x = jax.random.normal(keys[0], (n_rays, n_samples, input_dim), jnp.float32)
    z = jax.random.normal(keys[1], (n_rays, n_samples, skip_dim), jnp.float32)

    # torch.nn.Linear-style uniform(-1/sqrt(fan_in), 1/sqrt(fan_in)) init.
    weights, biases = [], []
    for li in range(n_layers):
        if li == 0:
            dimin = input_dim
        elif li in input_skips:
            dimin = hidden_dim + skip_dim
        else:
            dimin = hidden_dim
        bound = 1.0 / (dimin ** 0.5)
        w = jax.random.uniform(keys[2 + 2 * li], (dimin, hidden_dim),
                               jnp.float32, -bound, bound)
        b = jax.random.uniform(keys[3 + 2 * li], (hidden_dim,),
                               jnp.float32, -bound, bound)
        weights.append(w)
        biases.append(b)

    out = mlp_with_input_skips(x, z, weights, biases, input_skips, tile=256)
    out = jax.block_until_ready(out)

    ref = mlp_with_input_skips_ref(x, z, weights, biases, input_skips)
    assert out.shape == (n_rays, n_samples, hidden_dim), out.shape
    # Tolerance is loose because TPU default f32 matmul precision (bf16 MXU
    # passes) can differ between the XLA reference and the Mosaic kernel.
    assert jnp.allclose(out, ref, atol=2e-2, rtol=2e-2), "mismatch vs reference"

    print("KERNEL_OK")
</pallas_src>

<mosaic_0001>
module attributes {stable_mosaic.version = 11 : i64} {
  func.func @kernel(%arg0: i32, %arg1: memref<256x32xf32, #tpu.memory_space<vmem>>, %arg2: memref<256x32xf32, #tpu.memory_space<vmem>>, %arg3: memref<32x64xf32, #tpu.memory_space<vmem>>, %arg4: memref<1x64xf32, #tpu.memory_space<vmem>>, %arg5: memref<64x64xf32, #tpu.memory_space<vmem>>, %arg6: memref<1x64xf32, #tpu.memory_space<vmem>>, %arg7: memref<96x64xf32, #tpu.memory_space<vmem>>, %arg8: memref<1x64xf32, #tpu.memory_space<vmem>>, %arg9: memref<64x64xf32, #tpu.memory_space<vmem>>, %arg10: memref<1x64xf32, #tpu.memory_space<vmem>>, %arg11: memref<256x64xf32, #tpu.memory_space<vmem>>) attributes {dimension_semantics = [#tpu.dimension_semantics<parallel>], iteration_bounds = array<i64: 2>, scalar_prefetch = 0 : i64, scratch_operands = 0 : i64, tpu.core_type = #tpu.core_type<tc>, window_params = [{transform_indices = @transform_0, window_bounds = array<i64: 256, 32>}, {transform_indices = @transform_1, window_bounds = array<i64: 256, 32>}, {pipeline_mode = #tpu.pipeline_mode<synchronous>, transform_indices = @transform_2, window_bounds = array<i64: 32, 64>}, {pipeline_mode = #tpu.pipeline_mode<synchronous>, transform_indices = @transform_3, window_bounds = array<i64: 1, 64>}, {pipeline_mode = #tpu.pipeline_mode<synchronous>, transform_indices = @transform_4, window_bounds = array<i64: 64, 64>}, {pipeline_mode = #tpu.pipeline_mode<synchronous>, transform_indices = @transform_5, window_bounds = array<i64: 1, 64>}, {pipeline_mode = #tpu.pipeline_mode<synchronous>, transform_indices = @transform_6, window_bounds = array<i64: 96, 64>}, {pipeline_mode = #tpu.pipeline_mode<synchronous>, transform_indices = @transform_7, window_bounds = array<i64: 1, 64>}, {pipeline_mode = #tpu.pipeline_mode<synchronous>, transform_indices = @transform_8, window_bounds = array<i64: 64, 64>}, {pipeline_mode = #tpu.pipeline_mode<synchronous>, transform_indices = @transform_9, window_bounds = array<i64: 1, 64>}, {transform_indices = @transform_10, window_bounds = array<i64: 256, 64>}]} {
    %c0 = arith.constant 0 : index
    %c0_0 = arith.constant 0 : index
    %0 = vector.load %arg1[%c0, %c0_0] : memref<256x32xf32, #tpu.memory_space<vmem>>, vector<256x32xf32>
    %c0_1 = arith.constant 0 : index
    %c0_2 = arith.constant 0 : index
    %1 = vector.load %arg2[%c0_1, %c0_2] : memref<256x32xf32, #tpu.memory_space<vmem>>, vector<256x32xf32>
    %c0_3 = arith.constant 0 : index
    %c0_4 = arith.constant 0 : index
    %2 = vector.load %arg4[%c0_3, %c0_4] : memref<1x64xf32, #tpu.memory_space<vmem>>, vector<1x64xf32>
    %c0_5 = arith.constant 0 : index
    %c0_6 = arith.constant 0 : index
    %3 = vector.load %arg3[%c0_5, %c0_6] : memref<32x64xf32, #tpu.memory_space<vmem>>, vector<32x64xf32>
    %cst = arith.constant dense<0.000000e+00> : vector<256x64xf32>
    %4 = tpu.matmul %0, %3, %cst {dimension_numbers = #tpu.dot_dimension_numbers<[1], [0], [0], [1], [0, 0, 1, 1], [], []>} : vector<256x32xf32>, vector<32x64xf32>, vector<256x64xf32> -> vector<256x64xf32>
    %5 = vector.broadcast %2 : vector<1x64xf32> to vector<256x64xf32>
    %6 = arith.addf %4, %5 : vector<256x64xf32>
    %cst_7 = arith.constant 0.000000e+00 : f32
    %7 = vector.broadcast %cst_7 : f32 to vector<256x64xf32>
    %8 = arith.maximumf %6, %7 : vector<256x64xf32>
    %c0_8 = arith.constant 0 : index
    %c0_9 = arith.constant 0 : index
    %9 = vector.load %arg6[%c0_8, %c0_9] : memref<1x64xf32, #tpu.memory_space<vmem>>, vector<1x64xf32>
    %c0_10 = arith.constant 0 : index
    %c0_11 = arith.constant 0 : index
    %10 = vector.load %arg5[%c0_10, %c0_11] : memref<64x64xf32, #tpu.memory_space<vmem>>, vector<64x64xf32>
    %cst_12 = arith.constant dense<0.000000e+00> : vector<256x64xf32>
    %11 = tpu.matmul %8, %10, %cst_12 {dimension_numbers = #tpu.dot_dimension_numbers<[1], [0], [0], [1], [0, 0, 1, 1], [], []>} : vector<256x64xf32>, vector<64x64xf32>, vector<256x64xf32> -> vector<256x64xf32>
    %12 = vector.broadcast %9 : vector<1x64xf32> to vector<256x64xf32>
    %13 = arith.addf %11, %12 : vector<256x64xf32>
    %cst_13 = arith.constant 0.000000e+00 : f32
    %14 = vector.broadcast %cst_13 : f32 to vector<256x64xf32>
    %15 = arith.maximumf %13, %14 : vector<256x64xf32>
    %c0_14 = arith.constant 0 : index
    %c0_15 = arith.constant 0 : index
    %16 = vector.load %arg8[%c0_14, %c0_15] : memref<1x64xf32, #tpu.memory_space<vmem>>, vector<1x64xf32>
    %c0_16 = arith.constant 0 : index
    %c0_17 = arith.constant 0 : index
    %17 = vector.load %arg7[%c0_16, %c0_17] : memref<96x64xf32, #tpu.memory_space<vmem>>, vector<64x64xf32>
    %cst_18 = arith.constant dense<0.000000e+00> : vector<256x64xf32>
    %18 = tpu.matmul %15, %17, %cst_18 {dimension_numbers = #tpu.dot_dimension_numbers<[1], [0], [0], [1], [0, 0, 1, 1], [], []>} : vector<256x64xf32>, vector<64x64xf32>, vector<256x64xf32> -> vector<256x64xf32>
    %c64 = arith.constant 64 : index
    %c0_19 = arith.constant 0 : index
    %19 = vector.load %arg7[%c64, %c0_19] : memref<96x64xf32, #tpu.memory_space<vmem>>, vector<32x64xf32>
    %cst_20 = arith.constant dense<0.000000e+00> : vector<256x64xf32>
    %20 = tpu.matmul %1, %19, %cst_20 {dimension_numbers = #tpu.dot_dimension_numbers<[1], [0], [0], [1], [0, 0, 1, 1], [], []>} : vector<256x32xf32>, vector<32x64xf32>, vector<256x64xf32> -> vector<256x64xf32>
    %21 = arith.addf %18, %20 : vector<256x64xf32>
    %22 = vector.broadcast %16 : vector<1x64xf32> to vector<256x64xf32>
    %23 = arith.addf %21, %22 : vector<256x64xf32>
    %cst_21 = arith.constant 0.000000e+00 : f32
    %24 = vector.broadcast %cst_21 : f32 to vector<256x64xf32>
    %25 = arith.maximumf %23, %24 : vector<256x64xf32>
    %c0_22 = arith.constant 0 : index
    %c0_23 = arith.constant 0 : index
    %26 = vector.load %arg10[%c0_22, %c0_23] : memref<1x64xf32, #tpu.memory_space<vmem>>, vector<1x64xf32>
    %c0_24 = arith.constant 0 : index
    %c0_25 = arith.constant 0 : index
    %27 = vector.load %arg9[%c0_24, %c0_25] : memref<64x64xf32, #tpu.memory_space<vmem>>, vector<64x64xf32>
    %cst_26 = arith.constant dense<0.000000e+00> : vector<256x64xf32>
    %28 = tpu.matmul %25, %27, %cst_26 {dimension_numbers = #tpu.dot_dimension_numbers<[1], [0], [0], [1], [0, 0, 1, 1], [], []>} : vector<256x64xf32>, vector<64x64xf32>, vector<256x64xf32> -> vector<256x64xf32>
    %29 = vector.broadcast %26 : vector<1x64xf32> to vector<256x64xf32>
    %30 = arith.addf %28, %29 : vector<256x64xf32>
    %cst_27 = arith.constant 0.000000e+00 : f32
    %31 = vector.broadcast %cst_27 : f32 to vector<256x64xf32>
    %32 = arith.maximumf %30, %31 : vector<256x64xf32>
    %c0_28 = arith.constant 0 : index
    %c0_29 = arith.constant 0 : index
    %33 = vector.load %arg11[%c0_28, %c0_29] : memref<256x64xf32, #tpu.memory_space<vmem>>, vector<256x64xf32>
    tpu.vector_store %arg11[%c0_28, %c0_29], %32 {strides = array<i32>} : memref<256x64xf32, #tpu.memory_space<vmem>>, vector<256x64xf32>,
    return
  }
  func.func @transform_0(%arg0: i32) -> (i32, i32) {
    %c0_i32 = arith.constant 0 : i32
    %c0_i32_0 = arith.constant 0 : i32
    return %arg0, %c0_i32 : i32, i32
  }
  func.func @transform_1(%arg0: i32) -> (i32, i32) {
    %c0_i32 = arith.constant 0 : i32
    %c0_i32_0 = arith.constant 0 : i32
    return %arg0, %c0_i32 : i32, i32
  }
  func.func @transform_2(%arg0: i32) -> (i32, i32) {
    %c0_i32 = arith.constant 0 : i32
    %c0_i32_0 = arith.constant 0 : i32
    %c0_i32_1 = arith.constant 0 : i32
    return %c0_i32, %c0_i32_0 : i32, i32
  }
  func.func @transform_3(%arg0: i32) -> (i32, i32) {
    %c0_i32 = arith.constant 0 : i32
    %c0_i32_0 = arith.constant 0 : i32
    %c0_i32_1 = arith.constant 0 : i32
    return %c0_i32, %c0_i32_0 : i32, i32
  }
  func.func @transform_4(%arg0: i32) -> (i32, i32) {
    %c0_i32 = arith.constant 0 : i32
    %c0_i32_0 = arith.constant 0 : i32
    %c0_i32_1 = arith.constant 0 : i32
    return %c0_i32, %c0_i32_0 : i32, i32
  }
  func.func @transform_5(%arg0: i32) -> (i32, i32) {
    %c0_i32 = arith.constant 0 : i32
    %c0_i32_0 = arith.constant 0 : i32
    %c0_i32_1 = arith.constant 0 : i32
    return %c0_i32, %c0_i32_0 : i32, i32
  }
  func.func @transform_6(%arg0: i32) -> (i32, i32) {
    %c0_i32 = arith.constant 0 : i32
    %c0_i32_0 = arith.constant 0 : i32
    %c0_i32_1 = arith.constant 0 : i32
    return %c0_i32, %c0_i32_0 : i32, i32
  }
  func.func @transform_7(%arg0: i32) -> (i32, i32) {
    %c0_i32 = arith.constant 0 : i32
    %c0_i32_0 = arith.constant 0 : i32
    %c0_i32_1 = arith.constant 0 : i32
    return %c0_i32, %c0_i32_0 : i32, i32
  }
  func.func @transform_8(%arg0: i32) -> (i32, i32) {
    %c0_i32 = arith.constant 0 : i32
    %c0_i32_0 = arith.constant 0 : i32
    %c0_i32_1 = arith.constant 0 : i32
    return %c0_i32, %c0_i32_0 : i32, i32
  }
  func.func @transform_9(%arg0: i32) -> (i32, i32) {
    %c0_i32 = arith.constant 0 : i32
    %c0_i32_0 = arith.constant 0 : i32
    %c0_i32_1 = arith.constant 0 : i32
    return %c0_i32, %c0_i32_0 : i32, i32
  }
  func.func @transform_10(%arg0: i32) -> (i32, i32) {
    %c0_i32 = arith.constant 0 : i32
    %c0_i32_0 = arith.constant 0 : i32
    return %arg0, %c0_i32 : i32, i32
  }
}

</mosaic_0001>

<bundles_post_ra>
// kernel: tpu_custom_call.1
= control target key start
LH: loop header
LB: loop body
LE: loop exit
PB: predicated region body
PF: predicated region fallthrough
CT: control target
= control target key end

     0   :  { %s3128_s13 = smov 0   ;;  %s3733_s0 = inlined_call_operand.vmem [shape: f32[512,32], index: 0, kind: input, shape index: {}]   ;;  %s3734_s1 = inlined_call_operand.vmem [shape: f32[512,32], index: 1, kind: input, shape index: {}]   ;;  %s3735_s2 = inlined_call_operand.vmem [shape: f32[32,64], index: 2, kind: input, shape index: {}]   ;;  %s3736_s3 = inlined_call_operand.vmem [shape: f32[1,64], index: 3, kind: input, shape index: {}]   ;;  %s3737_s4 = inlined_call_operand.vmem [shape: f32[64,64], index: 4, kind: input, shape index: {}]   ;;  %s3738_s5 = inlined_call_operand.vmem [shape: f32[1,64], index: 5, kind: input, shape index: {}]   ;;  %s3739_s6 = inlined_call_operand.vmem [shape: f32[96,64], index: 6, kind: input, shape index: {}]   ;;  %s3740_s7 = inlined_call_operand.vmem [shape: f32[1,64], index: 7, kind: input, shape index: {}]   ;;  %s3741_s8 = inlined_call_operand.vmem [shape: f32[64,64], index: 8, kind: input, shape index: {}]   ;;  %s3742_s9 = inlined_call_operand.vmem [shape: f32[1,64], index: 9, kind: input, shape index: {}]   ;;  %s3743_s10 = inlined_call_operand.vmem [shape: f32[512,64], index: 10, kind: output, shape index: {}]  }
   0x1 LB: > { %s2376_s14 = sadd.s32 4294967295, %s3071_s13   ;;  %p2380_p0 = scmp.ge.s32.totalorder %s3071_s13, 1  ;;  %s3071_s13 = sphi %s3128_s13, %s20_s13  }
   0x2   : > { %p324_p1 = scmp.lt.s32.totalorder %s3071_s13, 3 }
   0x4   : > { %p325_p2 = pnand %p2380_p0, %p324_p1 }
   0x5   : > { %s2381_s19 = sshll.u32 (!%p325_p2), %s2376_s14, 5 }
   0x6   : > { %328 = sbr.rel (%p325_p2) target bundleno = 882 (0x372), region = 60  ;;  %p368_p3 = scmp.lt.s32.totalorder (!%p325_p2), %s2381_s19, 63 }
   0xb   : > { %v453_v0 = vld [vmem:[%s3735_s2 + $0x18] sm:$0xff]  ;;  %v452_v1 = vld [vmem:[%s3735_s2 + $0x10] sm:$0xff]  ;;  %v451_v2 = vld [vmem:[%s3735_s2 + $0x8] sm:$0xff]  ;;  %s3745_s19 = smov (!%p368_p3, %s2381_s19), 63  ;;  %vm460_vm0 = vcmask 261120   ;;  %vm829_vm1 = vcmask 523264  }
   0xc   : > { %2745 = vmatprep.subr.mxu0 %v453_v0  ;;  %3049 = vmatprep.subr.mxu1 %v453_v0  ;;  %v450_v3 = vld [vmem:[%s3735_s2] sm:$0xff]  ;;  %s3148_s24 = sshll.u32 %s3745_s19, 3  ;;  %v822_v4 = vld [vmem:[%s3737_s4 + $0x38] sm:$0xff]  ;;  %v821_v13 = vld [vmem:[%s3737_s4 + $0x30] sm:$0xff] }
   0xd   : > { %2746 = vmatpush3.msra.mxu0 %v453_v0  ;;  %3053 = vmatpush3.msra.mxu1 %v453_v0  ;;  %s3154_s27 = scalar_lea.vmem %s3733_s0, %s3148_s24  ;;  %v820_v18 = vld [vmem:[%s3737_s4 + $0x28] sm:$0xff]  ;;  %v819_v20 = vld [vmem:[%s3737_s4 + $0x20] sm:$0xff]  ;;  %v818_v24 = vld [vmem:[%s3737_s4 + $0x18] sm:$0xff]  ;;  %s3371_s17 = scalar_lea.vmem %s3734_s1, %s3148_s24 }
   0xe   : > { %2747 = vmatprep.subr.mxu0 %v452_v1  ;;  %3050 = vmatprep.subr.mxu1 %v452_v1  ;;  %v385_v5 = vld [vmem:[%s3154_s27] sm:$0xff]  ;;  %v386_v6 = vld [vmem:[%s3154_s27 + $0x8] sm:$0xff]  ;;  %v387_v7 = vld [vmem:[%s3154_s27 + $0x10] sm:$0xff]  ;;  %s3633_s25 = scalar_lea.vmem %s3743_s10, %s3148_s24 }
   0xf   : > { %2748 = vmatpush3.msra.mxu0 %v452_v1  ;;  %3054 = vmatpush3.msra.mxu1 %v452_v1  ;;  %v388_v8 = vld [vmem:[%s3154_s27 + $0x18] sm:$0xff]  ;;  %v389_v9 = vld [vmem:[%s3154_s27 + $0x20] sm:$0xff]  ;;  %v402_v11 = vld [vmem:[%s3154_s27 + $0x88] sm:$0xff] }
  0x10   : > { %2749 = vmatprep.subr.mxu0 %v451_v2  ;;  %3051 = vmatprep.subr.mxu1 %v451_v2  ;;  %v401_v10 = vld [vmem:[%s3154_s27 + $0x80] sm:$0xff]  ;;  %v403_v12 = vld [vmem:[%s3154_s27 + $0x90] sm:$0xff]  ;;  %v390_v14 = vld [vmem:[%s3154_s27 + $0x28] sm:$0xff] }
  0x11   : > { %2750 = vmatpush3.msra.mxu0 %v451_v2  ;;  %3055 = vmatpush3.msra.mxu1 %v451_v2  ;;  %v391_v15 = vld [vmem:[%s3154_s27 + $0x30] sm:$0xff]  ;;  %v404_v16 = vld [vmem:[%s3154_s27 + $0x98] sm:$0xff]  ;;  %v405_v17 = vld [vmem:[%s3154_s27 + $0xa0] sm:$0xff] }
  0x12   : > { %2751 = vmatprep.subr.mxu0 %v450_v3  ;;  %3052 = vmatprep.subr.mxu1 %v450_v3  ;;  %v392_v19 = vld [vmem:[%s3154_s27 + $0x38] sm:$0xff]  ;;  %v393_v21 = vld [vmem:[%s3154_s27 + $0x40] sm:$0xff]  ;;  %v406_v22 = vld [vmem:[%s3154_s27 + $0xa8] sm:$0xff] }
  0x13   : > { %2752 = vmatpush3.msra.mxu0 %v450_v3  ;;  %2753 = vmatprep.mubr.msk.f32.mxu0 %vm460_vm0, %v385_v5  ;;  %v407_v23 = vld [vmem:[%s3154_s27 + $0xb0] sm:$0xff]  ;;  %v394_v25 = vld [vmem:[%s3154_s27 + $0x48] sm:$0xff]  ;;  %v408_v27 = vld [vmem:[%s3154_s27 + $0xb8] sm:$0xff] }
  0x14   : > { %2754 = vmatmul.mubr.msk.f32.vlgmr.msra.gmra.mxu0 %vm460_vm0, %v386_v6  ;;  %3056 = vmatpush3.msra.mxu1 %v450_v3  ;;  %v395_v26 = vld [vmem:[%s3154_s27 + $0x50] sm:$0xff]  ;;  %v409_v28 = vld [vmem:[%s3154_s27 + $0xc0] sm:$0xff]  ;;  %v396_v30 = vld [vmem:[%s3154_s27 + $0x58] sm:$0xff] }
  0x15   : > { %2756 = vmatprep.mubr.msk.f32.mxu0 %vm460_vm0, %v387_v7  ;;  %2801 = vmatprep.subr.mxu1 %v822_v4  ;;  %v817_v29 = vld [vmem:[%s3737_s4 + $0x10] sm:$0xff]  ;;  %v816_v31 = vld [vmem:[%s3737_s4 + $0x8] sm:$0xff]  ;;  %v397_v32 = vld [vmem:[%s3154_s27 + $0x60] sm:$0xff] }
  0x16   : > { %2777 = vmatprep.mubr.msk.f32.mxu1 %vm460_vm0, %v401_v10  ;;  %v410_v33 = vld [vmem:[%s3154_s27 + $0xc8] sm:$0xff]  ;;  %v411_v34 = vld [vmem:[%s3154_s27 + $0xd0] sm:$0xff]  ;;  %v412_v37 = vld [vmem:[%s3154_s27 + $0xd8] sm:$0xff] }
  0x17   : > { %2778 = vmatmul.mubr.msk.f32.vlgmr.msra.gmra.mxu1 %vm460_vm0, %v402_v11  ;;  %v398_v35 = vld [vmem:[%s3154_s27 + $0x68] sm:$0xff]  ;;  %v399_v36 = vld [vmem:[%s3154_s27 + $0x70] sm:$0xff]  ;;  %v413_v38 = vld [vmem:[%s3154_s27 + $0xe0] sm:$0xff] }
  0x18   : > { %2757 = vmatmul.mubr.msk.f32.gmra.mxu0 %vm460_vm0, %v388_v8  ;;  %2780 = vmatprep.mubr.msk.f32.mxu1 %vm460_vm0, %v403_v12  ;;  %v400_v39 = vld [vmem:[%s3154_s27 + $0x78] sm:$0xff]  ;;  %v414_v40 = vld [vmem:[%s3154_s27 + $0xe8] sm:$0xff]  ;;  %v415_v41 = vld [vmem:[%s3154_s27 + $0xf0] sm:$0xff] }
  0x19   : > { %2759 = vmatprep.mubr.msk.f32.mxu0 %vm460_vm0, %v389_v9  ;;  %2802 = vmatpush3.msra.mxu1 %v822_v4  ;;  %v416_v42 = vld [vmem:[%s3154_s27 + $0xf8] sm:$0xff]  ;;  %v815_v43 = vld [vmem:[%s3737_s4] sm:$0xff]  ;;  %v1194_v46 = vld [vmem:[%s3739_s6 + $0x50] sm:$0xff] }
  0x1a   : > { %2803 = vmatprep.subr.mxu1 %v821_v13  ;;  %v1191_v44 = vld [vmem:[%s3739_s6 + $0x38] sm:$0xff]  ;;  %v1193_v47 = vld [vmem:[%s3739_s6 + $0x48] sm:$0xff]  ;;  %v1192_v48 = vld [vmem:[%s3739_s6 + $0x40] sm:$0xff] }
  0x1b   : > { %2804 = vmatpush3.msra.mxu1 %v821_v13  ;;  %v1195_v45 = vld [vmem:[%s3739_s6 + $0x58] sm:$0xff]  ;;  %v3262_v49 = vld [vmem:[%s3736_s3] ss:$0 sm:$0xff]  ;;  %v1190_v62 = vld [vmem:[%s3739_s6 + $0x30] sm:$0xff] }
  0x1c   : > { %2760 = vmatmul.mubr.msk.f32.gmra.mxu0 %vm460_vm0, %v390_v14  ;;  %2781 = vmatmul.mubr.msk.f32.gmra.mxu1 %vm460_vm0, %v404_v16  ;;  %v1189_v2 = vld [vmem:[%s3739_s6 + $0x28] sm:$0xff]  ;;  %v1188_v8 = vld [vmem:[%s3739_s6 + $0x20] sm:$0xff]  ;;  %v1187_v12 = vld [vmem:[%s3739_s6 + $0x18] sm:$0xff] }
  0x1d   : > { %2762 = vmatprep.mubr.msk.f32.mxu0 %vm460_vm0, %v391_v15  ;;  %2783 = vmatprep.mubr.msk.f32.mxu1 %vm460_vm0, %v405_v17 }
  0x1e   : > { %2805 = vmatprep.subr.mxu1 %v820_v18  ;;  %2865 = vmatprep.subr.mxu0 %v1195_v45 }
  0x1f   : > { %2806 = vmatpush3.msra.mxu1 %v820_v18  ;;  %2866 = vmatpush3.msra.mxu0 %v1195_v45  ;;  %v1186_v18 = vld [vmem:[%s3739_s6 + $0x10] sm:$0xff] }
  0x20   : > { %2763 = vmatmul.mubr.msk.f32.gmra.mxu0 %vm460_vm0, %v392_v19  ;;  %2807 = vmatprep.subr.mxu1 %v819_v20 }
  0x21   : > { %2765 = vmatprep.mubr.msk.f32.mxu0 %vm460_vm0, %v393_v21  ;;  %2784 = vmatmul.mubr.msk.f32.gmra.mxu1 %vm460_vm0, %v406_v22  ;;  %v1185_v21 = vld [vmem:[%s3739_s6 + $0x8] sm:$0xff] }
  0x22   : > { %2786 = vmatprep.mubr.msk.f32.mxu1 %vm460_vm0, %v407_v23  ;;  %2808 = vmatpush3.msra.mxu1 %v819_v20 }
  0x23   : > { %2809 = vmatprep.subr.mxu1 %v818_v24  ;;  %2867 = vmatprep.subr.mxu0 %v1194_v46 }
  0x24   : > { %2766 = vmatmul.mubr.msk.f32.gmra.mxu0 %vm460_vm0, %v394_v25  ;;  %2810 = vmatpush3.msra.mxu1 %v818_v24 }
  0x25   : > { %2768 = vmatprep.mubr.msk.f32.mxu0 %vm460_vm0, %v395_v26  ;;  %2787 = vmatmul.mubr.msk.f32.gmra.mxu1 %vm460_vm0, %v408_v27  ;;  %v1184_v27 = vld [vmem:[%s3739_s6] sm:$0xff] }
  0x26   : > { %2789 = vmatprep.mubr.msk.f32.mxu1 %vm460_vm0, %v409_v28  ;;  %2811 = vmatprep.subr.mxu1 %v817_v29 }
  0x27   : > { %2812 = vmatpush3.msra.mxu1 %v817_v29  ;;  %2868 = vmatpush3.msra.mxu0 %v1194_v46 }
  0x28   : > { %2769 = vmatmul.mubr.msk.f32.gmra.mxu0 %vm460_vm0, %v396_v30  ;;  %2813 = vmatprep.subr.mxu1 %v816_v31 }
  0x29   : > { %2771 = vmatprep.mubr.msk.f32.mxu0 %vm460_vm0, %v397_v32  ;;  %2790 = vmatmul.mubr.msk.f32.gmra.mxu1 %vm460_vm0, %v410_v33 }
  0x2a   : > { %2792 = vmatprep.mubr.msk.f32.mxu1 %vm460_vm0, %v411_v34  ;;  %2814 = vmatpush3.msra.mxu1 %v816_v31 }
  0x2b   : > { %2815 = vmatprep.subr.mxu1 %v815_v43  ;;  %2869 = vmatprep.subr.mxu0 %v1193_v47 }
  0x2c   : > { %2772 = vmatmul.mubr.msk.f32.gmra.mxu0 %vm460_vm0, %v398_v35  ;;  %2816 = vmatpush3.msra.mxu1 %v815_v43 }
  0x2d   : > { %2774 = vmatprep.mubr.msk.f32.mxu0 %vm460_vm0, %v399_v36  ;;  %2793 = vmatmul.mubr.msk.f32.gmra.mxu1 %vm460_vm0, %v412_v37 }
  0x2e   : > { %2795 = vmatprep.mubr.msk.f32.mxu1 %vm460_vm0, %v413_v38  ;;  %2921 = vmatprep.subr.mxu1 %v1191_v44 }
  0x2f   : > { %2870 = vmatpush3.msra.mxu0 %v1193_v47 }
  0x30   : > { %2775 = vmatmul.mubr.msk.f32.gmra.mxu0 %vm460_vm0, %v400_v39  ;;  %2871 = vmatprep.subr.mxu0 %v1192_v48 }
  0x31   : > { %2796 = vmatmul.mubr.msk.f32.gmra.mxu1 %vm460_vm0, %v414_v40  ;;  %2872 = vmatpush3.msra.mxu0 %v1192_v48 }
  0x32   : > { %2798 = vmatprep.mubr.msk.f32.mxu1 %vm460_vm0, %v415_v41 }
  0x35   : > { %2799 = vmatmul.mubr.msk.f32.gmra.mxu1 %vm460_vm0, %v416_v42 }
  0xd4   : > { %v2755_v50 = vpop.f32.mrf.mxu0 }
  0xd5   : > { %v629_v51 = vadd.f32 %v2755_v50, %v3262_v49 }
  0xd6   : > { %v623_v52 = vpop.f32.mrf.mxu0 }
  0xd7   : > { %v624_v53 = vadd.f32 %v3262_v49, %v623_v52  ;;  %v3266_v56 = vpop.f32.mrf.mxu1  ;;  %v783_v57 = vmax.f32 %v629_v51, 0.0 }
  0xd8   : > { %v2758_v54 = vpop.f32.mrf.mxu0 }
  0xd9   : > { %v782_v55 = vmax.f32 %v624_v53, 0.0  ;;  %v639_v58 = vadd.f32 %v2758_v54, %v3262_v49  ;;  %v3271_v61 = vpop.f32.mrf.mxu1 }
  0xda   : > { %v633_v59 = vpop.f32.mrf.mxu0 }
  0xdb   : > { %v634_v60 = vadd.f32 %v3262_v49, %v633_v59  ;;  %2817 = vmatprep.mubr.msk.f32.mxu1 %vm829_vm1, %v782_v55  ;;  %v785_v3 = vmax.f32 %v639_v58, 0.0  ;;  %v709_v55 = vadd.f32 %v3266_v56, %v3262_v49 }
  0xdc   : > { %v2761_v63 = vpop.f32.mrf.mxu0  ;;  %2818 = vmatmul.mubr.msk.f32.vlgmr.msra.gmra.mxu1 %vm829_vm1, %v783_v57  ;;  %v3277_v1 = vpop.f32.mrf.mxu1 }
  0xdd   : > { %v784_v0 = vmax.f32 %v634_v60, 0.0  ;;  %2922 = vmatpush3.msra.mxu1 %v1191_v44  ;;  %v649_v4 = vadd.f32 %v2761_v63, %v3262_v49  ;;  %v704_v44 = vadd.f32 %v3262_v49, %v3271_v61  ;;  %v799_v60 = vmax.f32 %v709_v55, 0.0  ;;  %v446_v55 = vld [vmem:[%s3371_s17 + $0xe8] sm:$0xff] }
  0xde   : > { %v643_v5 = vpop.f32.mrf.mxu0  ;;  %2923 = vmatprep.subr.mxu1 %v1190_v62  ;;  %v3285_v7 = vpop.f32.mrf.mxu1  ;;  %v719_v61 = vadd.f32 %v3277_v1, %v3262_v49 }
  0xdf   : > { %v644_v6 = vadd.f32 %v3262_v49, %v643_v5  ;;  %2820 = vmatprep.mubr.msk.f32.mxu1 %vm829_vm1, %v784_v0  ;;  %2924 = vmatpush3.msra.mxu1 %v1190_v62  ;;  %v787_v13 = vmax.f32 %v649_v4, 0.0  ;;  %v798_v52 = vmax.f32 %v704_v44, 0.0  ;;  %v714_v53 = vadd.f32 %v3262_v49, %v3285_v7  ;;  %v436_v44 = vld [vmem:[%s3371_s17 + $0x98] sm:$0xff] }
  0xe0   : > { %v2764_v9 = vpop.f32.mrf.mxu0  ;;  %2821 = vmatmul.mubr.msk.f32.gmra.mxu1 %vm829_vm1, %v785_v3  ;;  %2925 = vmatprep.subr.mxu1 %v1189_v2  ;;  %v801_v0 = vmax.f32 %v719_v61, 0.0  ;;  %v1914_v61 = vld [vmem:[%s3741_s8 + $0x28] sm:$0xff] }
  0xe1   : > { %v786_v10 = vmax.f32 %v644_v6, 0.0  ;;  %v3291_v11 = vpop.f32.mrf.mxu1  ;;  %2926 = vmatpush3.msra.mxu1 %v1189_v2  ;;  %v659_v14 = vadd.f32 %v2764_v9, %v3262_v49  ;;  %v800_v58 = vmax.f32 %v714_v53, 0.0  ;;  %v444_v53 = vld [vmem:[%s3371_s17 + $0xd8] sm:$0xff] }
  0xe2   : > { %v653_v15 = vpop.f32.mrf.mxu0  ;;  %2927 = vmatprep.subr.mxu1 %v1188_v8  ;;  %v729_v2 = vadd.f32 %v3291_v11, %v3262_v49 }
  0xe3   : > { %v654_v16 = vadd.f32 %v3262_v49, %v653_v15  ;;  %2823 = vmatprep.mubr.msk.f32.mxu1 %vm829_vm1, %v786_v10  ;;  %v723_v17 = vpop.f32.mrf.mxu1  ;;  %2928 = vmatpush3.msra.mxu1 %v1188_v8  ;;  %v789_v22 = vmax.f32 %v659_v14, 0.0 }
  0xe4   : > { %v2767_v19 = vpop.f32.mrf.mxu0  ;;  %2824 = vmatmul.mubr.msk.f32.gmra.mxu1 %vm829_vm1, %v787_v13  ;;  %2929 = vmatprep.subr.mxu1 %v1187_v12  ;;  %v724_v59 = vadd.f32 %v3262_v49, %v723_v17  ;;  %v803_v5 = vmax.f32 %v729_v2, 0.0  ;;  %v3461_v2 = vld [vmem:[%s3738_s5] ss:$0 sm:$0xff] }
  0xe5   : > { %v788_v20 = vmax.f32 %v654_v16, 0.0  ;;  %2930 = vmatpush3.msra.mxu1 %v1187_v12  ;;  %v669_v23 = vadd.f32 %v2767_v19, %v3262_v49  ;;  %v3307_v25 = vpop.f32.mrf.mxu1 }
  0xe6   : > { %v663_v24 = vpop.f32.mrf.mxu0  ;;  %2931 = vmatprep.subr.mxu1 %v1186_v18  ;;  %v802_v63 = vmax.f32 %v724_v59, 0.0  ;;  %v739_v6 = vadd.f32 %v3307_v25, %v3262_v49  ;;  %v1916_v59 = vld [vmem:[%s3741_s8 + $0x38] sm:$0xff] }
  0xe7   : > { %v664_v26 = vadd.f32 %v3262_v49, %v663_v24  ;;  %2826 = vmatprep.mubr.msk.f32.mxu1 %vm829_vm1, %v788_v20  ;;  %2932 = vmatpush3.msra.mxu1 %v1186_v18  ;;  %v791_v30 = vmax.f32 %v669_v23, 0.0  ;;  %v733_v33 = vpop.f32.mrf.mxu1 }
  0xe8   : > { %v2770_v28 = vpop.f32.mrf.mxu0  ;;  %2827 = vmatmul.mubr.msk.f32.gmra.mxu1 %vm829_vm1, %v789_v22  ;;  %2933 = vmatprep.subr.mxu1 %v1185_v21  ;;  %v734_v56 = vadd.f32 %v3262_v49, %v733_v33  ;;  %v805_v10 = vmax.f32 %v739_v6, 0.0  ;;  %v425_v33 = vld [vmem:[%s3371_s17 + $0x40] sm:$0xff] }
  0xe9   : > { %v790_v29 = vmax.f32 %v664_v26, 0.0  ;;  %2934 = vmatpush3.msra.mxu1 %v1185_v21  ;;  %v679_v31 = vadd.f32 %v2770_v28, %v3262_v49  ;;  %v2791_v40 = vpop.f32.mrf.mxu1  ;;  %v418_v26 = vld [vmem:[%s3371_s17 + $0x8] sm:$0xff]  ;;  %v420_v28 = vld [vmem:[%s3371_s17 + $0x18] sm:$0xff]  ;;  %2985 = vmatprep.subr.mxu0 %v1916_v59 }
  0xea   : > { %v673_v32 = vpop.f32.mrf.mxu0  ;;  %2935 = vmatprep.subr.mxu1 %v1184_v27  ;;  %v804_v4 = vmax.f32 %v734_v56, 0.0  ;;  %v749_v11 = vadd.f32 %v2791_v40, %v3262_v49  ;;  %v432_v40 = vld [vmem:[%s3371_s17 + $0x78] sm:$0xff]  ;;  %v1911_v56 = vld [vmem:[%s3741_s8 + $0x10] sm:$0xff] }
  0xeb   : > { %v674_v34 = vadd.f32 %v3262_v49, %v673_v32  ;;  %2829 = vmatprep.mubr.msk.f32.mxu1 %vm829_vm1, %v790_v29  ;;  %2936 = vmatpush3.msra.mxu1 %v1184_v27  ;;  %v793_v37 = vmax.f32 %v679_v31, 0.0  ;;  %v743_v48 = vpop.f32.mrf.mxu1  ;;  %v419_v27 = vld [vmem:[%s3371_s17 + $0x10] sm:$0xff]  ;;  %v421_v29 = vld [vmem:[%s3371_s17 + $0x20] sm:$0xff]  ;;  %v424_v32 = vld [vmem:[%s3371_s17 + $0x38] sm:$0xff] }
  0xec   : > { %v2773_v35 = vpop.f32.mrf.mxu0  ;;  %2830 = vmatmul.mubr.msk.f32.gmra.mxu1 %vm829_vm1, %v791_v30  ;;  %v744_v1 = vadd.f32 %v3262_v49, %v743_v48  ;;  %v807_v15 = vmax.f32 %v749_v11, 0.0  ;;  %v422_v30 = vld [vmem:[%s3371_s17 + $0x28] sm:$0xff]  ;;  %v423_v31 = vld [vmem:[%s3371_s17 + $0x30] sm:$0xff]  ;;  %v440_v48 = vld [vmem:[%s3371_s17 + $0xb8] sm:$0xff] }
  0xed   : > { %v792_v36 = vmax.f32 %v674_v34, 0.0  ;;  %v689_v38 = vadd.f32 %v2773_v35, %v3262_v49  ;;  %v2794_v57 = vpop.f32.mrf.mxu1  ;;  %v426_v34 = vld [vmem:[%s3371_s17 + $0x48] sm:$0xff]  ;;  %v427_v35 = vld [vmem:[%s3371_s17 + $0x50] sm:$0xff] }
  0xee   : > { %v683_v39 = vpop.f32.mrf.mxu0  ;;  %v806_v8 = vmax.f32 %v744_v1, 0.0  ;;  %v759_v16 = vadd.f32 %v2794_v57, %v3262_v49  ;;  %v447_v57 = vld [vmem:[%s3371_s17 + $0xf0] sm:$0xff] }
  0xef   : > { %v684_v41 = vadd.f32 %v3262_v49, %v683_v39  ;;  %2832 = vmatprep.mubr.msk.f32.mxu1 %vm829_vm1, %v792_v36  ;;  %v795_v45 = vmax.f32 %v689_v38, 0.0  ;;  %v753_v62 = vpop.f32.mrf.mxu1  ;;  %v428_v36 = vld [vmem:[%s3371_s17 + $0x58] sm:$0xff]  ;;  %v430_v38 = vld [vmem:[%s3371_s17 + $0x68] sm:$0xff]  ;;  %v431_v39 = vld [vmem:[%s3371_s17 + $0x70] sm:$0xff] }
  0xf0   : > { %v2776_v42 = vpop.f32.mrf.mxu0  ;;  %2833 = vmatmul.mubr.msk.f32.gmra.mxu1 %vm829_vm1, %v793_v37  ;;  %v754_v9 = vadd.f32 %v3262_v49, %v753_v62  ;;  %v809_v20 = vmax.f32 %v759_v16, 0.0  ;;  %v429_v37 = vld [vmem:[%s3371_s17 + $0x60] sm:$0xff] }
  0xf1   : > { %v794_v43 = vmax.f32 %v684_v41, 0.0  ;;  %v699_v46 = vadd.f32 %v2776_v42, %v3262_v49  ;;  %v2797_v3 = vpop.f32.mrf.mxu1  ;;  %v433_v41 = vld [vmem:[%s3371_s17 + $0x80] sm:$0xff]  ;;  %v434_v42 = vld [vmem:[%s3371_s17 + $0x88] sm:$0xff] }
  0xf2   : > { %v693_v47 = vpop.f32.mrf.mxu0  ;;  %v808_v13 = vmax.f32 %v754_v9, 0.0  ;;  %v769_v21 = vadd.f32 %v2797_v3, %v3262_v49  ;;  %v1913_v62 = vld [vmem:[%s3741_s8 + $0x20] sm:$0xff] }
  0xf3   : > { %v694_v50 = vadd.f32 %v3262_v49, %v693_v47  ;;  %2835 = vmatprep.mubr.msk.f32.mxu1 %vm829_vm1, %v794_v43  ;;  %v797_v54 = vmax.f32 %v699_v46, 0.0  ;;  %v763_v7 = vpop.f32.mrf.mxu1  ;;  %v435_v43 = vld [vmem:[%s3371_s17 + $0x90] sm:$0xff]  ;;  %v438_v46 = vld [vmem:[%s3371_s17 + $0xa8] sm:$0xff] }
  0xf4   : > { %2836 = vmatmul.mubr.msk.f32.gmra.mxu1 %vm829_vm1, %v795_v45  ;;  %v764_v14 = vadd.f32 %v3262_v49, %v763_v7  ;;  %v811_v23 = vmax.f32 %v769_v21, 0.0  ;;  %v437_v45 = vld [vmem:[%s3371_s17 + $0xa0] sm:$0xff]  ;;  %v439_v47 = vld [vmem:[%s3371_s17 + $0xb0] sm:$0xff] }
  0xf5   : > { %v796_v51 = vmax.f32 %v694_v50, 0.0  ;;  %v2800_v12 = vpop.f32.mrf.mxu1  ;;  %v441_v50 = vld [vmem:[%s3371_s17 + $0xc0] sm:$0xff] }
  0xf6   : > { %v810_v18 = vmax.f32 %v764_v14, 0.0  ;;  %v779_v24 = vadd.f32 %v2800_v12, %v3262_v49 }
  0xf7   : > { %2838 = vmatprep.mubr.msk.f32.mxu1 %vm829_vm1, %v796_v51  ;;  %v773_v17 = vpop.f32.mrf.mxu1  ;;  %v442_v51 = vld [vmem:[%s3371_s17 + $0xc8] sm:$0xff] }
  0xf8   : > { %2839 = vmatmul.mubr.msk.f32.gmra.mxu1 %vm829_vm1, %v797_v54  ;;  %v774_v19 = vadd.f32 %v3262_v49, %v773_v17  ;;  %v813_v25 = vmax.f32 %v779_v24, 0.0  ;;  %v417_v49 = vld [vmem:[%s3371_s17] sm:$0xff] }
  0xf9   : > { %2841 = vmatprep.mubr.msk.f32.mxu1 %vm829_vm1, %v798_v52  ;;  %2873 = vmatprep.mubr.msk.f32.mxu0 %vm460_vm0, %v417_v49  ;;  %v443_v52 = vld [vmem:[%s3371_s17 + $0xd0] sm:$0xff]  ;;  %v445_v54 = vld [vmem:[%s3371_s17 + $0xe0] sm:$0xff] }
  0xfa   : > { %v812_v22 = vmax.f32 %v774_v19, 0.0  ;;  %2874 = vmatmul.mubr.msk.f32.vlgmr.msra.gmra.mxu0 %vm460_vm0, %v418_v26 }
  0xfb   : > { %2876 = vmatprep.mubr.msk.f32.mxu0 %vm460_vm0, %v419_v27  ;;  %2986 = vmatpush3.msra.mxu0 %v1916_v59 }
  0xfc   : > { %2842 = vmatmul.mubr.msk.f32.gmra.mxu1 %vm829_vm1, %v799_v60  ;;  %v1915_v60 = vld [vmem:[%s3741_s8 + $0x30] sm:$0xff] }
  0xfd   : > { %2844 = vmatprep.mubr.msk.f32.mxu1 %vm829_vm1, %v800_v58  ;;  %v448_v58 = vld [vmem:[%s3371_s17 + $0xf8] sm:$0xff]  ;;  %2987 = vmatprep.subr.mxu0 %v1915_v60 }
  0xfe   : > { %2877 = vmatmul.mubr.msk.f32.gmra.mxu0 %vm460_vm0, %v420_v28 }
  0xff   : > { %2879 = vmatprep.mubr.msk.f32.mxu0 %vm460_vm0, %v421_v29  ;;  %2988 = vmatpush3.msra.mxu0 %v1915_v60 }
 0x100   : > { %2845 = vmatmul.mubr.msk.f32.gmra.mxu1 %vm829_vm1, %v801_v0  ;;  %2989 = vmatprep.subr.mxu0 %v1914_v61  ;;  %v1910_v0 = vld [vmem:[%s3741_s8 + $0x8] sm:$0xff] }
 0x101   : > { %2847 = vmatprep.mubr.msk.f32.mxu1 %vm829_vm1, %v802_v63  ;;  %2990 = vmatpush3.msra.mxu0 %v1914_v61  ;;  %v1912_v63 = vld [vmem:[%s3741_s8 + $0x18] sm:$0xff] }
 0x102   : > { %2880 = vmatmul.mubr.msk.f32.gmra.mxu0 %vm460_vm0, %v422_v30  ;;  %2991 = vmatprep.subr.mxu0 %v1913_v62 }
 0x103   : > { %2882 = vmatprep.mubr.msk.f32.mxu0 %vm460_vm0, %v423_v31  ;;  %2992 = vmatpush3.msra.mxu0 %v1913_v62 }
 0x104   : > { %2848 = vmatmul.mubr.msk.f32.gmra.mxu1 %vm829_vm1, %v803_v5  ;;  %2993 = vmatprep.subr.mxu0 %v1912_v63 }
 0x105   : > { %2850 = vmatprep.mubr.msk.f32.mxu1 %vm829_vm1, %v804_v4  ;;  %2994 = vmatpush3.msra.mxu0 %v1912_v63 }
 0x106   : > { %2883 = vmatmul.mubr.msk.f32.gmra.mxu0 %vm460_vm0, %v424_v32  ;;  %2995 = vmatprep.subr.mxu0 %v1911_v56 }
 0x107   : > { %2885 = vmatprep.mubr.msk.f32.mxu0 %vm460_vm0, %v425_v33  ;;  %2996 = vmatpush3.msra.mxu0 %v1911_v56 }
 0x108   : > { %2851 = vmatmul.mubr.msk.f32.gmra.mxu1 %vm829_vm1, %v805_v10  ;;  %2997 = vmatprep.subr.mxu0 %v1910_v0 }
 0x109   : > { %2853 = vmatprep.mubr.msk.f32.mxu1 %vm829_vm1, %v806_v8  ;;  %2998 = vmatpush3.msra.mxu0 %v1910_v0 }
 0x10a   : > { %2886 = vmatmul.mubr.msk.f32.gmra.mxu0 %vm460_vm0, %v426_v34 }
 0x10b   : > { %2888 = vmatprep.mubr.msk.f32.mxu0 %vm460_vm0, %v427_v35 }
 0x10c   : > { %2854 = vmatmul.mubr.msk.f32.gmra.mxu1 %vm829_vm1, %v807_v15 }
 0x10d   : > { %2856 = vmatprep.mubr.msk.f32.mxu1 %vm829_vm1, %v808_v13 }
 0x10e   : > { %2889 = vmatmul.mubr.msk.f32.gmra.mxu0 %vm460_vm0, %v428_v36 }
 0x10f   : > { %2891 = vmatprep.mubr.msk.f32.mxu0 %vm460_vm0, %v429_v37 }
 0x110   : > { %2857 = vmatmul.mubr.msk.f32.gmra.mxu1 %vm829_vm1, %v809_v20 }
 0x111   : > { %2859 = vmatprep.mubr.msk.f32.mxu1 %vm829_vm1, %v810_v18 }
 0x112   : > { %2892 = vmatmul.mubr.msk.f32.gmra.mxu0 %vm460_vm0, %v430_v38 }
 0x113   : > { %2894 = vmatprep.mubr.msk.f32.mxu0 %vm460_vm0, %v431_v39 }
 0x114   : > { %2860 = vmatmul.mubr.msk.f32.gmra.mxu1 %vm829_vm1, %v811_v23 }
 0x115   : > { %2862 = vmatprep.mubr.msk.f32.mxu1 %vm829_vm1, %v812_v22 }
 0x116   : > { %2895 = vmatmul.mubr.msk.f32.gmra.mxu0 %vm460_vm0, %v432_v40 }
 0x117   : > { %2897 = vmatprep.mubr.msk.f32.mxu0 %vm460_vm0, %v433_v41 }
 0x118   : > { %2863 = vmatmul.mubr.msk.f32.gmra.mxu1 %vm829_vm1, %v813_v25 }
 0x11a   : > { %2898 = vmatmul.mubr.msk.f32.gmra.mxu0 %vm460_vm0, %v434_v42 }
 0x11b   : > { %2900 = vmatprep.mubr.msk.f32.mxu0 %vm460_vm0, %v435_v43 }
 0x11e   : > { %2901 = vmatmul.mubr.msk.f32.gmra.mxu0 %vm460_vm0, %v436_v44 }
 0x11f   : > { %2903 = vmatprep.mubr.msk.f32.mxu0 %vm460_vm0, %v437_v45 }
 0x122   : > { %2904 = vmatmul.mubr.msk.f32.gmra.mxu0 %vm460_vm0, %v438_v46 }
 0x123   : > { %2906 = vmatprep.mubr.msk.f32.mxu0 %vm460_vm0, %v439_v47 }
 0x126   : > { %2907 = vmatmul.mubr.msk.f32.gmra.mxu0 %vm460_vm0, %v440_v48 }
 0x127   : > { %2909 = vmatprep.mubr.msk.f32.mxu0 %vm460_vm0, %v441_v50 }
 0x12a   : > { %2910 = vmatmul.mubr.msk.f32.gmra.mxu0 %vm460_vm0, %v442_v51 }
 0x12b   : > { %2912 = vmatprep.mubr.msk.f32.mxu0 %vm460_vm0, %v443_v52 }
 0x12e   : > { %2913 = vmatmul.mubr.msk.f32.gmra.mxu0 %vm460_vm0, %v444_v53 }
 0x12f   : > { %2915 = vmatprep.mubr.msk.f32.mxu0 %vm460_vm0, %v445_v54 }
 0x132   : > { %2916 = vmatmul.mubr.msk.f32.gmra.mxu0 %vm460_vm0, %v446_v55 }
 0x133   : > { %2918 = vmatprep.mubr.msk.f32.mxu0 %vm460_vm0, %v447_v57 }
 0x136   : > { %2919 = vmatmul.mubr.msk.f32.gmra.mxu0 %vm460_vm0, %v448_v58 }
 0x19c   : > { %v2819_v3 = vpop.f32.mrf.mxu1 }
 0x19d   : > { %v998_v4 = vadd.f32 %v2819_v3, %v3461_v2 }
 0x19e   : > { %v992_v1 = vpop.f32.mrf.mxu1 }
 0x19f   : > { %v993_v5 = vadd.f32 %v3461_v2, %v992_v1  ;;  %v1152_v8 = vmax.f32 %v998_v4, 0.0 }
 0x1a0   : > { %v2822_v6 = vpop.f32.mrf.mxu1 }
 0x1a1   : > { %v1151_v7 = vmax.f32 %v993_v5, 0.0  ;;  %v1008_v9 = vadd.f32 %v2822_v6, %v3461_v2 }
 0x1a2   : > { %v1002_v10 = vpop.f32.mrf.mxu1 }
 0x1a3   : > { %v1003_v11 = vadd.f32 %v3461_v2, %v1002_v10  ;;  %2937 = vmatprep.mubr.msk.f32.mxu1 %vm829_vm1, %v1151_v7  ;;  %v1154_v14 = vmax.f32 %v1008_v9, 0.0 }
 0x1a4   : > { %v2825_v12 = vpop.f32.mrf.mxu1  ;;  %2938 = vmatmul.mubr.msk.f32.vlgmr.msra.gmra.mxu1 %vm829_vm1, %v1152_v8 }
 0x1a5   : > { %v1153_v13 = vmax.f32 %v1003_v11, 0.0  ;;  %v1018_v15 = vadd.f32 %v2825_v12, %v3461_v2 }
 0x1a6   : > { %v1012_v16 = vpop.f32.mrf.mxu1 }
 0x1a7   : > { %v1013_v17 = vadd.f32 %v3461_v2, %v1012_v16  ;;  %2940 = vmatprep.mubr.msk.f32.mxu1 %vm829_vm1, %v1153_v13  ;;  %v1156_v20 = vmax.f32 %v1018_v15, 0.0 }
 0x1a8   : > { %v2828_v18 = vpop.f32.mrf.mxu1  ;;  %2941 = vmatmul.mubr.msk.f32.gmra.mxu1 %vm829_vm1, %v1154_v14 }
 0x1a9   : > { %v1155_v19 = vmax.f32 %v1013_v17, 0.0  ;;  %v1028_v21 = vadd.f32 %v2828_v18, %v3461_v2 }
 0x1aa   : > { %v1022_v22 = vpop.f32.mrf.mxu1 }
 0x1ab   : > { %v1023_v23 = vadd.f32 %v3461_v2, %v1022_v22  ;;  %2943 = vmatprep.mubr.msk.f32.mxu1 %vm829_vm1, %v1155_v19  ;;  %v1158_v49 = vmax.f32 %v1028_v21, 0.0 }
 0x1ac   : > { %v2831_v24 = vpop.f32.mrf.mxu1  ;;  %2944 = vmatmul.mubr.msk.f32.gmra.mxu1 %vm829_vm1, %v1156_v20 }
 0x1ad   : > { %v1157_v25 = vmax.f32 %v1023_v23, 0.0  ;;  %v1038_v26 = vadd.f32 %v2831_v24, %v3461_v2 }
 0x1ae   : > { %v1032_v27 = vpop.f32.mrf.mxu1 }
 0x1af   : > { %v1033_v28 = vadd.f32 %v3461_v2, %v1032_v27  ;;  %2946 = vmatprep.mubr.msk.f32.mxu1 %vm829_vm1, %v1157_v25  ;;  %v1160_v31 = vmax.f32 %v1038_v26, 0.0 }
 0x1b0   : > { %v2834_v29 = vpop.f32.mrf.mxu1  ;;  %2947 = vmatmul.mubr.msk.f32.gmra.mxu1 %vm829_vm1, %v1158_v49 }
 0x1b1   : > { %v1159_v30 = vmax.f32 %v1033_v28, 0.0  ;;  %v1048_v32 = vadd.f32 %v2834_v29, %v3461_v2 }
 0x1b2   : > { %v1042_v33 = vpop.f32.mrf.mxu1 }
 0x1b3   : > { %v1043_v34 = vadd.f32 %v3461_v2, %v1042_v33  ;;  %2949 = vmatprep.mubr.msk.f32.mxu1 %vm829_vm1, %v1159_v30  ;;  %v1162_v37 = vmax.f32 %v1048_v32, 0.0 }
 0x1b4   : > { %v2837_v35 = vpop.f32.mrf.mxu1  ;;  %2950 = vmatmul.mubr.msk.f32.gmra.mxu1 %vm829_vm1, %v1160_v31 }
 0x1b5   : > { %v1161_v36 = vmax.f32 %v1043_v34, 0.0  ;;  %v1058_v38 = vadd.f32 %v2837_v35, %v3461_v2  ;;  %v1909_v34 = vld [vmem:[%s3741_s8] sm:$0xff] }
 0x1b6   : > { %v1052_v39 = vpop.f32.mrf.mxu1  ;;  %2999 = vmatprep.subr.mxu0 %v1909_v34 }
 0x1b7   : > { %v1053_v40 = vadd.f32 %v3461_v2, %v1052_v39  ;;  %2952 = vmatprep.mubr.msk.f32.mxu1 %vm829_vm1, %v1161_v36  ;;  %v1164_v43 = vmax.f32 %v1058_v38, 0.0  ;;  %3000 = vmatpush3.msra.mxu0 %v1909_v34 }
 0x1b8   : > { %v2840_v41 = vpop.f32.mrf.mxu1  ;;  %2953 = vmatmul.mubr.msk.f32.gmra.mxu1 %vm829_vm1, %v1162_v37 }
 0x1b9   : > { %v1163_v42 = vmax.f32 %v1053_v40, 0.0  ;;  %v1068_v44 = vadd.f32 %v2840_v41, %v3461_v2 }
 0x1ba   : > { %v1062_v45 = vpop.f32.mrf.mxu1  ;;  %v2875_v35 = vpop.f32.mrf.mxu0 }
 0x1bb   : > { %v1063_v46 = vadd.f32 %v3461_v2, %v1062_v45  ;;  %2955 = vmatprep.mubr.msk.f32.mxu1 %vm829_vm1, %v1163_v42  ;;  %v1166_v50 = vmax.f32 %v1068_v44, 0.0 }
 0x1bc   : > { %v2843_v47 = vpop.f32.mrf.mxu1  ;;  %2956 = vmatmul.mubr.msk.f32.gmra.mxu1 %vm829_vm1, %v1164_v43  ;;  %v1358_v36 = vpop.f32.mrf.mxu0 }
 0x1bd   : > { %v1165_v48 = vmax.f32 %v1063_v46, 0.0  ;;  %v1078_v51 = vadd.f32 %v2843_v47, %v3461_v2 }
 0x1be   : > { %v1072_v52 = vpop.f32.mrf.mxu1  ;;  %v2878_v37 = vpop.f32.mrf.mxu0 }
 0x1bf   : > { %v1073_v53 = vadd.f32 %v3461_v2, %v1072_v52  ;;  %2958 = vmatprep.mubr.msk.f32.mxu1 %vm829_vm1, %v1165_v48  ;;  %v1168_v57 = vmax.f32 %v1078_v51, 0.0  ;;  %v3541_v52 = vld [vmem:[%s3740_s7] ss:$0 sm:$0xff] }
 0x1c0   : > { %v2846_v54 = vpop.f32.mrf.mxu1  ;;  %2959 = vmatmul.mubr.msk.f32.gmra.mxu1 %vm829_vm1, %v1166_v50 }
 0x1c1   : > { %v1167_v55 = vmax.f32 %v1073_v53, 0.0  ;;  %v1088_v58 = vadd.f32 %v2846_v54, %v3461_v2 }
 0x1c2   : > { %v1082_v59 = vpop.f32.mrf.mxu1 }
 0x1c3   : > { %v1083_v60 = vadd.f32 %v3461_v2, %v1082_v59  ;;  %2961 = vmatprep.mubr.msk.f32.mxu1 %vm829_vm1, %v1167_v55  ;;  %v1170_v63 = vmax.f32 %v1088_v58, 0.0 }
 0x1c4   : > { %v2849_v61 = vpop.f32.mrf.mxu1  ;;  %2962 = vmatmul.mubr.msk.f32.gmra.mxu1 %vm829_vm1, %v1168_v57 }
 0x1c5   : > { %v1169_v62 = vmax.f32 %v1083_v60, 0.0  ;;  %v1098_v56 = vadd.f32 %v2849_v61, %v3461_v2 }
 0x1c6   : > { %v1092_v0 = vpop.f32.mrf.mxu1 }
 0x1c7   : > { %v1093_v3 = vadd.f32 %v3461_v2, %v1092_v0  ;;  %2964 = vmatprep.mubr.msk.f32.mxu1 %vm829_vm1, %v1169_v62  ;;  %v1172_v5 = vmax.f32 %v1098_v56, 0.0 }
 0x1c8   : > { %v2852_v4 = vpop.f32.mrf.mxu1  ;;  %2965 = vmatmul.mubr.msk.f32.gmra.mxu1 %vm829_vm1, %v1170_v63 }
 0x1c9   : > { %v1171_v1 = vmax.f32 %v1093_v3, 0.0  ;;  %v1108_v6 = vadd.f32 %v2852_v4, %v3461_v2 }
 0x1ca   : > { %v1102_v7 = vpop.f32.mrf.mxu1 }
 0x1cb   : > { %v1103_v8 = vadd.f32 %v3461_v2, %v1102_v7  ;;  %2967 = vmatprep.mubr.msk.f32.mxu1 %vm829_vm1, %v1171_v1  ;;  %v1174_v11 = vmax.f32 %v1108_v6, 0.0 }
 0x1cc   : > { %v2855_v9 = vpop.f32.mrf.mxu1  ;;  %2968 = vmatmul.mubr.msk.f32.gmra.mxu1 %vm829_vm1, %v1172_v5 }
 0x1cd   : > { %v1173_v10 = vmax.f32 %v1103_v8, 0.0  ;;  %v1118_v12 = vadd.f32 %v2855_v9, %v3461_v2 }
 0x1ce   : > { %v1112_v13 = vpop.f32.mrf.mxu1 }
 0x1cf   : > { %v1113_v14 = vadd.f32 %v3461_v2, %v1112_v13  ;;  %2970 = vmatprep.mubr.msk.f32.mxu1 %vm829_vm1, %v1173_v10  ;;  %v1176_v17 = vmax.f32 %v1118_v12, 0.0 }
 0x1d0   : > { %v2858_v15 = vpop.f32.mrf.mxu1  ;;  %2971 = vmatmul.mubr.msk.f32.gmra.mxu1 %vm829_vm1, %v1174_v11 }
 0x1d1   : > { %v1175_v16 = vmax.f32 %v1113_v14, 0.0  ;;  %v1128_v18 = vadd.f32 %v2858_v15, %v3461_v2 }
 0x1d2   : > { %v1122_v19 = vpop.f32.mrf.mxu1 }
 0x1d3   : > { %v1123_v20 = vadd.f32 %v3461_v2, %v1122_v19  ;;  %2973 = vmatprep.mubr.msk.f32.mxu1 %vm829_vm1, %v1175_v16  ;;  %v1178_v23 = vmax.f32 %v1128_v18, 0.0 }
 0x1d4   : > { %v2861_v21 = vpop.f32.mrf.mxu1  ;;  %2974 = vmatmul.mubr.msk.f32.gmra.mxu1 %vm829_vm1, %v1176_v17 }
 0x1d5   : > { %v1177_v22 = vmax.f32 %v1123_v20, 0.0  ;;  %v1138_v24 = vadd.f32 %v2861_v21, %v3461_v2 }
 0x1d6   : > { %v1132_v25 = vpop.f32.mrf.mxu1 }
 0x1d7   : > { %v1133_v49 = vadd.f32 %v3461_v2, %v1132_v25  ;;  %2976 = vmatprep.mubr.msk.f32.mxu1 %vm829_vm1, %v1177_v22  ;;  %v1180_v28 = vmax.f32 %v1138_v24, 0.0 }
 0x1d8   : > { %v2864_v26 = vpop.f32.mrf.mxu1  ;;  %2977 = vmatmul.mubr.msk.f32.gmra.mxu1 %vm829_vm1, %v1178_v23 }
 0x1d9   : > { %v1179_v27 = vmax.f32 %v1133_v49, 0.0  ;;  %v1148_v29 = vadd.f32 %v2864_v26, %v3461_v2 }
 0x1da   : > { %v1142_v30 = vpop.f32.mrf.mxu1 }
 0x1db   : > { %v1143_v31 = vadd.f32 %v3461_v2, %v1142_v30  ;;  %2979 = vmatprep.mubr.msk.f32.mxu1 %vm829_vm1, %v1179_v27  ;;  %v1182_v33 = vmax.f32 %v1148_v29, 0.0  ;;  %v1368_v2 = vpop.f32.mrf.mxu0 }
 0x1dc   : > { %2980 = vmatmul.mubr.msk.f32.gmra.mxu1 %vm829_vm1, %v1180_v28 }
 0x1dd   : > { %v1181_v32 = vmax.f32 %v1143_v31, 0.0  ;;  %v2881_v38 = vpop.f32.mrf.mxu0 }
 0x1df   : > { %2982 = vmatprep.mubr.msk.f32.mxu1 %vm829_vm1, %v1181_v32  ;;  %v1378_v39 = vpop.f32.mrf.mxu0 }
 0x1e0   : > { %2983 = vmatmul.mubr.msk.f32.gmra.mxu1 %vm829_vm1, %v1182_v33 }
 0x1e1   : > { %v2884_v40 = vpop.f32.mrf.mxu0 }
 0x1e3   : > { %v1388_v41 = vpop.f32.mrf.mxu0 }
 0x1e5   : > { %v2887_v42 = vpop.f32.mrf.mxu0 }
 0x1e7   : > { %v1398_v43 = vpop.f32.mrf.mxu0 }
 0x1e9   : > { %v2890_v44 = vpop.f32.mrf.mxu0 }
 0x1eb   : > { %v1408_v45 = vpop.f32.mrf.mxu0 }
 0x1ed   : > { %v3530_v46 = vpop.f32.mrf.mxu0 }
 0x1ef   : > { %v3532_v47 = vpop.f32.mrf.mxu0 }
 0x1f1   : > { %v3534_v48 = vpop.f32.mrf.mxu0 }
 0x1f3   : > { %v3536_v50 = vpop.f32.mrf.mxu0 }
 0x1f5   : > { %v3543_v55 = vpop.f32.mrf.mxu0 }
 0x1f7   : > { %v3547_v63 = vpop.f32.mrf.mxu0 }
 0x1f9   : > { %v3553_v8 = vpop.f32.mrf.mxu0 }
 0x1fb   : > { %v3559_v17 = vpop.f32.mrf.mxu0 }
 0x1fd   : > { %v2905_v49 = vpop.f32.mrf.mxu0 }
 0x1ff   : > { %v1458_v34 = vpop.f32.mrf.mxu0 }
 0x264   : > { %v2939_v51 = vpop.f32.mrf.mxu1 }
 0x265   : > { %v1685_v53 = vadd.f32 %v2939_v51, %v2875_v35 }
 0x266   : > { %v1679_v54 = vpop.f32.mrf.mxu1 }
 0x267   : > { %v1680_v57 = vadd.f32 %v1679_v54, %v1358_v36  ;;  %v1845_v58 = vadd.f32 %v3541_v52, %v1685_v53 }
 0x268   : > { %v2942_v59 = vpop.f32.mrf.mxu1 }
 0x269   : > { %v1844_v60 = vadd.f32 %v3541_v52, %v1680_v57  ;;  %v1695_v61 = vadd.f32 %v2942_v59, %v2878_v37  ;;  %v1877_v3 = vmax.f32 %v1845_v58, 0.0 }
 0x26a   : > { %v1689_v62 = vpop.f32.mrf.mxu1 }
 0x26b   : > { %v1876_v56 = vmax.f32 %v1844_v60, 0.0  ;;  %v1690_v0 = vadd.f32 %v1689_v62, %v1368_v2  ;;  %v1847_v4 = vadd.f32 %v3541_v52, %v1695_v61 }
 0x26c   : > { %v2945_v1 = vpop.f32.mrf.mxu1 }
 0x26d   : > { %v1846_v5 = vadd.f32 %v3541_v52, %v1690_v0  ;;  %v1705_v6 = vadd.f32 %v2945_v1, %v2881_v38  ;;  %3001 = vmatprep.mubr.msk.f32.mxu0 %vm829_vm1, %v1876_v56  ;;  %v1879_v11 = vmax.f32 %v1847_v4, 0.0 }
 0x26e   : > { %v1699_v7 = vpop.f32.mrf.mxu1  ;;  %3002 = vmatmul.mubr.msk.f32.vlgmr.msra.gmra.mxu0 %vm829_vm1, %v1877_v3 }
 0x26f   : > { %v1878_v9 = vmax.f32 %v1846_v5, 0.0  ;;  %v1700_v10 = vadd.f32 %v1699_v7, %v1378_v39  ;;  %v1849_v12 = vadd.f32 %v3541_v52, %v1705_v6 }
 0x270   : > { %v2948_v13 = vpop.f32.mrf.mxu1 }
 0x271   : > { %v1848_v14 = vadd.f32 %v3541_v52, %v1700_v10  ;;  %v1715_v15 = vadd.f32 %v2948_v13, %v2884_v40  ;;  %3004 = vmatprep.mubr.msk.f32.mxu0 %vm829_vm1, %v1878_v9  ;;  %v1881_v20 = vmax.f32 %v1849_v12, 0.0 }
 0x272   : > { %v1709_v16 = vpop.f32.mrf.mxu1  ;;  %3005 = vmatmul.mubr.msk.f32.gmra.mxu0 %vm829_vm1, %v1879_v11 }
 0x273   : > { %v1880_v18 = vmax.f32 %v1848_v14, 0.0  ;;  %v1710_v19 = vadd.f32 %v1709_v16, %v1388_v41  ;;  %v1851_v21 = vadd.f32 %v3541_v52, %v1715_v15 }
 0x274   : > { %v2951_v22 = vpop.f32.mrf.mxu1 }
 0x275   : > { %v1850_v23 = vadd.f32 %v3541_v52, %v1710_v19  ;;  %v1725_v24 = vadd.f32 %v2951_v22, %v2887_v42  ;;  %3007 = vmatprep.mubr.msk.f32.mxu0 %vm829_vm1, %v1880_v18  ;;  %v1883_v28 = vmax.f32 %v1851_v21, 0.0  ;;  %v2908_v42 = vpop.f32.mrf.mxu0 }
 0x276   : > { %v1719_v25 = vpop.f32.mrf.mxu1  ;;  %3008 = vmatmul.mubr.msk.f32.gmra.mxu0 %vm829_vm1, %v1881_v20 }
 0x277   : > { %v1882_v26 = vmax.f32 %v1850_v23, 0.0  ;;  %v1720_v27 = vadd.f32 %v1719_v25, %v1398_v43  ;;  %v1853_v29 = vadd.f32 %v3541_v52, %v1725_v24  ;;  %v1468_v58 = vpop.f32.mrf.mxu0 }
 0x278   : > { %v2954_v30 = vpop.f32.mrf.mxu1 }
 0x279   : > { %v1852_v31 = vadd.f32 %v3541_v52, %v1720_v27  ;;  %v1735_v32 = vadd.f32 %v2954_v30, %v2890_v44  ;;  %3010 = vmatprep.mubr.msk.f32.mxu0 %vm829_vm1, %v1882_v26  ;;  %v1885_v37 = vmax.f32 %v1853_v29, 0.0  ;;  %v2911_v3 = vpop.f32.mrf.mxu0 }
 0x27a   : > { %v1729_v33 = vpop.f32.mrf.mxu1  ;;  %3011 = vmatmul.mubr.msk.f32.gmra.mxu0 %vm829_vm1, %v1883_v28 }
 0x27b   : > { %v1884_v35 = vmax.f32 %v1852_v31, 0.0  ;;  %v1730_v36 = vadd.f32 %v1729_v33, %v1408_v45  ;;  %v1855_v2 = vadd.f32 %v3541_v52, %v1735_v32  ;;  %v1478_v10 = vpop.f32.mrf.mxu0 }
 0x27c   : > { %v2957_v38 = vpop.f32.mrf.mxu1 }
 0x27d   : > { %v1854_v39 = vadd.f32 %v3541_v52, %v1730_v36  ;;  %v1745_v40 = vadd.f32 %v2957_v38, %v3530_v46  ;;  %3013 = vmatprep.mubr.msk.f32.mxu0 %vm829_vm1, %v1884_v35  ;;  %v1887_v51 = vmax.f32 %v1855_v2, 0.0 }
 0x27e   : > { %v1739_v41 = vpop.f32.mrf.mxu1  ;;  %3014 = vmatmul.mubr.msk.f32.gmra.mxu0 %vm829_vm1, %v1885_v37 }
 0x27f   : > { %v1886_v43 = vmax.f32 %v1854_v39, 0.0  ;;  %v1740_v44 = vadd.f32 %v1739_v41, %v3532_v47  ;;  %v1857_v45 = vadd.f32 %v3541_v52, %v1745_v40 }
 0x280   : > { %v2960_v53 = vpop.f32.mrf.mxu1 }
 0x281   : > { %v1856_v54 = vadd.f32 %v3541_v52, %v1740_v44  ;;  %v1755_v57 = vadd.f32 %v2960_v53, %v3534_v48  ;;  %3016 = vmatprep.mubr.msk.f32.mxu0 %vm829_vm1, %v1886_v43  ;;  %v1889_v61 = vmax.f32 %v1857_v45, 0.0 }
 0x282   : > { %v1749_v46 = vpop.f32.mrf.mxu1  ;;  %3017 = vmatmul.mubr.msk.f32.gmra.mxu0 %vm829_vm1, %v1887_v51 }
 0x283   : > { %v1888_v59 = vmax.f32 %v1856_v54, 0.0  ;;  %v1750_v60 = vadd.f32 %v1749_v46, %v3536_v50  ;;  %v1859_v47 = vadd.f32 %v3541_v52, %v1755_v57 }
 0x284   : > { %v2963_v62 = vpop.f32.mrf.mxu1 }
 0x285   : > { %v1858_v56 = vadd.f32 %v3541_v52, %v1750_v60  ;;  %v1765_v0 = vadd.f32 %v2963_v62, %v3543_v55  ;;  %3019 = vmatprep.mubr.msk.f32.mxu0 %vm829_vm1, %v1888_v59  ;;  %v1891_v5 = vmax.f32 %v1859_v47, 0.0 }
 0x286   : > { %v1759_v48 = vpop.f32.mrf.mxu1  ;;  %3020 = vmatmul.mubr.msk.f32.gmra.mxu0 %vm829_vm1, %v1889_v61 }
 0x287   : > { %v1890_v4 = vmax.f32 %v1858_v56, 0.0  ;;  %v1760_v1 = vadd.f32 %v1759_v48, %v3547_v63  ;;  %v1861_v50 = vadd.f32 %v3541_v52, %v1765_v0 }
 0x288   : > { %v2966_v6 = vpop.f32.mrf.mxu1 }
 0x289   : > { %v1860_v7 = vadd.f32 %v3541_v52, %v1760_v1  ;;  %v1775_v9 = vadd.f32 %v2966_v6, %v3553_v8  ;;  %3022 = vmatprep.mubr.msk.f32.mxu0 %vm829_vm1, %v1890_v4  ;;  %v1893_v13 = vmax.f32 %v1861_v50, 0.0  ;;  %v2914_v8 = vpop.f32.mrf.mxu0 }
 0x28a   : > { %v1769_v55 = vpop.f32.mrf.mxu1  ;;  %3023 = vmatmul.mubr.msk.f32.gmra.mxu0 %vm829_vm1, %v1891_v5 }
 0x28b   : > { %v1892_v11 = vmax.f32 %v1860_v7, 0.0  ;;  %v1770_v12 = vadd.f32 %v1769_v55, %v3559_v17  ;;  %v1863_v63 = vadd.f32 %v3541_v52, %v1775_v9  ;;  %v3626_v55 = vld [vmem:[%s3742_s9] ss:$0 sm:$0xff] }
 0x28c   : > { %v2969_v14 = vpop.f32.mrf.mxu1 }
 0x28d   : > { %v1862_v15 = vadd.f32 %v3541_v52, %v1770_v12  ;;  %v1785_v16 = vadd.f32 %v2969_v14, %v2905_v49  ;;  %3025 = vmatprep.mubr.msk.f32.mxu0 %vm829_vm1, %v1892_v11  ;;  %v1895_v21 = vmax.f32 %v1863_v63, 0.0  ;;  %v1488_v49 = vpop.f32.mrf.mxu0 }
 0x28e   : > { %v1779_v18 = vpop.f32.mrf.mxu1  ;;  %3026 = vmatmul.mubr.msk.f32.gmra.mxu0 %vm829_vm1, %v1893_v13 }
 0x28f   : > { %v1894_v19 = vmax.f32 %v1862_v15, 0.0  ;;  %v1780_v20 = vadd.f32 %v1779_v18, %v1458_v34  ;;  %v1865_v22 = vadd.f32 %v3541_v52, %v1785_v16  ;;  %v2917_v34 = vpop.f32.mrf.mxu0 }
 0x290   : > { %v2972_v23 = vpop.f32.mrf.mxu1 }
 0x291   : > { %v1864_v17 = vadd.f32 %v3541_v52, %v1780_v20  ;;  %v1795_v24 = vadd.f32 %v2972_v23, %v2908_v42  ;;  %3028 = vmatprep.mubr.msk.f32.mxu0 %vm829_vm1, %v1894_v19  ;;  %v1897_v28 = vmax.f32 %v1865_v22, 0.0  ;;  %v1498_v42 = vpop.f32.mrf.mxu0 }
 0x292   : > { %v1789_v25 = vpop.f32.mrf.mxu1  ;;  %3029 = vmatmul.mubr.msk.f32.gmra.mxu0 %vm829_vm1, %v1895_v21 }
 0x293   : > { %v1896_v26 = vmax.f32 %v1864_v17, 0.0  ;;  %v1790_v27 = vadd.f32 %v1789_v25, %v1468_v58  ;;  %v1867_v29 = vadd.f32 %v3541_v52, %v1795_v24  ;;  %v2920_v46 = vpop.f32.mrf.mxu0 }
 0x294   : > { %v2975_v30 = vpop.f32.mrf.mxu1 }
 0x295   : > { %v1866_v31 = vadd.f32 %v3541_v52, %v1790_v27  ;;  %v1805_v32 = vadd.f32 %v2975_v30, %v2911_v3  ;;  %3031 = vmatprep.mubr.msk.f32.mxu0 %vm829_vm1, %v1896_v26  ;;  %v1899_v37 = vmax.f32 %v1867_v29, 0.0  ;;  %v1508_v48 = vpop.f32.mrf.mxu0 }
 0x296   : > { %v1799_v33 = vpop.f32.mrf.mxu1  ;;  %3032 = vmatmul.mubr.msk.f32.gmra.mxu0 %vm829_vm1, %v1897_v28 }
 0x297   : > { %v1898_v35 = vmax.f32 %v1866_v31, 0.0  ;;  %v1800_v36 = vadd.f32 %v1799_v33, %v1478_v10  ;;  %v1869_v2 = vadd.f32 %v3541_v52, %v1805_v32 }
 0x298   : > { %v2978_v38 = vpop.f32.mrf.mxu1 }
 0x299   : > { %v1868_v39 = vadd.f32 %v3541_v52, %v1800_v36  ;;  %v1815_v40 = vadd.f32 %v2978_v38, %v2914_v8  ;;  %3034 = vmatprep.mubr.msk.f32.mxu0 %vm829_vm1, %v1898_v35  ;;  %v1901_v51 = vmax.f32 %v1869_v2, 0.0 }
 0x29a   : > { %v1809_v41 = vpop.f32.mrf.mxu1  ;;  %3035 = vmatmul.mubr.msk.f32.gmra.mxu0 %vm829_vm1, %v1899_v37 }
 0x29b   : > { %v1900_v43 = vmax.f32 %v1868_v39, 0.0  ;;  %v1810_v44 = vadd.f32 %v1809_v41, %v1488_v49  ;;  %v1871_v45 = vadd.f32 %v3541_v52, %v1815_v40 }
 0x29c   : > { %v2981_v53 = vpop.f32.mrf.mxu1 }
 0x29d   : > { %v1870_v54 = vadd.f32 %v3541_v52, %v1810_v44  ;;  %v1825_v57 = vadd.f32 %v2981_v53, %v2917_v34  ;;  %3037 = vmatprep.mubr.msk.f32.mxu0 %vm829_vm1, %v1900_v43  ;;  %v1903_v61 = vmax.f32 %v1871_v45, 0.0 }
 0x29e   : > { %v1819_v58 = vpop.f32.mrf.mxu1  ;;  %3038 = vmatmul.mubr.msk.f32.gmra.mxu0 %vm829_vm1, %v1901_v51 }
 0x29f   : > { %v1902_v59 = vmax.f32 %v1870_v54, 0.0  ;;  %v1820_v60 = vadd.f32 %v1819_v58, %v1498_v42  ;;  %v1873_v47 = vadd.f32 %v3541_v52, %v1825_v57 }
 0x2a0   : > { %v2984_v62 = vpop.f32.mrf.mxu1 }
 0x2a1   : > { %v1872_v56 = vadd.f32 %v3541_v52, %v1820_v60  ;;  %v1835_v0 = vadd.f32 %v2984_v62, %v2920_v46  ;;  %3040 = vmatprep.mubr.msk.f32.mxu0 %vm829_vm1, %v1902_v59  ;;  %v1905_v5 = vmax.f32 %v1873_v47, 0.0 }
 0x2a2   : > { %v1829_v3 = vpop.f32.mrf.mxu1  ;;  %3041 = vmatmul.mubr.msk.f32.gmra.mxu0 %vm829_vm1, %v1903_v61 }
 0x2a3   : > { %v1904_v4 = vmax.f32 %v1872_v56, 0.0  ;;  %v1830_v1 = vadd.f32 %v1829_v3, %v1508_v48  ;;  %v1875_v50 = vadd.f32 %v3541_v52, %v1835_v0 }
 0x2a5   : > { %v1874_v6 = vadd.f32 %v3541_v52, %v1830_v1  ;;  %3043 = vmatprep.mubr.msk.f32.mxu0 %vm829_vm1, %v1904_v4  ;;  %v1907_v9 = vmax.f32 %v1875_v50, 0.0 }
 0x2a6   : > { %3044 = vmatmul.mubr.msk.f32.gmra.mxu0 %vm829_vm1, %v1905_v5 }
 0x2a7   : > { %v1906_v7 = vmax.f32 %v1874_v6, 0.0 }
 0x2a9   : > { %3046 = vmatprep.mubr.msk.f32.mxu0 %vm829_vm1, %v1906_v7 }
 0x2aa   : > { %3047 = vmatmul.mubr.msk.f32.gmra.mxu0 %vm829_vm1, %v1907_v9 }
 0x32e   : > { %v3003_v10 = vpop.f32.mrf.mxu0 }
 0x32f   : > { %v2091_v11 = vadd.f32 %v3003_v10, %v3626_v55 }
 0x330   : > { %v2085_v52 = vpop.f32.mrf.mxu0 }
 0x331   : > { %v2245_v12 = vmax.f32 %v2091_v11, 0.0  ;;  %v2086_v13 = vadd.f32 %v3626_v55, %v2085_v52 }
 0x332   : > { %v3006_v63 = vpop.f32.mrf.mxu0 }
 0x333   : > { %2277 = vst.msk [vmem:[%s3633_s25 + $0x8] sm:$0xff] %vm829_vm1, %v2245_v12  ;;  %v2244_v14 = vmax.f32 %v2086_v13, 0.0  ;;  %v2101_v15 = vadd.f32 %v3006_v63, %v3626_v55 }
 0x334   : > { %v2095_v16 = vpop.f32.mrf.mxu0 }
 0x335   : > { %2276 = vst.msk [vmem:[%s3633_s25] sm:$0xff] %vm829_vm1, %v2244_v14  ;;  %v2247_v18 = vmax.f32 %v2101_v15, 0.0  ;;  %v2096_v8 = vadd.f32 %v3626_v55, %v2095_v16 }
 0x336   : > { %v3009_v19 = vpop.f32.mrf.mxu0 }
 0x337   : > { %2279 = vst.msk [vmem:[%s3633_s25 + $0x18] sm:$0xff] %vm829_vm1, %v2247_v18  ;;  %v2246_v20 = vmax.f32 %v2096_v8, 0.0  ;;  %v2111_v21 = vadd.f32 %v3009_v19, %v3626_v55 }
 0x338   : > { %v2105_v22 = vpop.f32.mrf.mxu0 }
 0x339   : > { %2278 = vst.msk [vmem:[%s3633_s25 + $0x10] sm:$0xff] %vm829_vm1, %v2246_v20  ;;  %v2249_v23 = vmax.f32 %v2111_v21, 0.0  ;;  %v2106_v17 = vadd.f32 %v3626_v55, %v2105_v22 }
 0x33a   : > { %v3012_v24 = vpop.f32.mrf.mxu0 }
 0x33b   : > { %2281 = vst.msk [vmem:[%s3633_s25 + $0x28] sm:$0xff] %vm829_vm1, %v2249_v23  ;;  %v2248_v25 = vmax.f32 %v2106_v17, 0.0  ;;  %v2121_v49 = vadd.f32 %v3012_v24, %v3626_v55 }
 0x33c   : > { %v2115_v26 = vpop.f32.mrf.mxu0 }
 0x33d   : > { %2280 = vst.msk [vmem:[%s3633_s25 + $0x20] sm:$0xff] %vm829_vm1, %v2248_v25  ;;  %v2251_v27 = vmax.f32 %v2121_v49, 0.0  ;;  %v2116_v28 = vadd.f32 %v3626_v55, %v2115_v26 }
 0x33e   : > { %v3015_v29 = vpop.f32.mrf.mxu0 }
 0x33f   : > { %2283 = vst.msk [vmem:[%s3633_s25 + $0x38] sm:$0xff] %vm829_vm1, %v2251_v27  ;;  %v2250_v30 = vmax.f32 %v2116_v28, 0.0  ;;  %v2131_v31 = vadd.f32 %v3015_v29, %v3626_v55 }
 0x340   : > { %v2125_v32 = vpop.f32.mrf.mxu0 }
 0x341   : > { %2282 = vst.msk [vmem:[%s3633_s25 + $0x30] sm:$0xff] %vm829_vm1, %v2250_v30  ;;  %v2253_v33 = vmax.f32 %v2131_v31, 0.0  ;;  %v2126_v34 = vadd.f32 %v3626_v55, %v2125_v32 }
 0x342   : > { %v3018_v35 = vpop.f32.mrf.mxu0 }
 0x343   : > { %2285 = vst.msk [vmem:[%s3633_s25 + $0x48] sm:$0xff] %vm829_vm1, %v2253_v33  ;;  %v2252_v36 = vmax.f32 %v2126_v34, 0.0  ;;  %v2141_v37 = vadd.f32 %v3018_v35, %v3626_v55 }
 0x344   : > { %v2135_v2 = vpop.f32.mrf.mxu0 }
 0x345   : > { %2284 = vst.msk [vmem:[%s3633_s25 + $0x40] sm:$0xff] %vm829_vm1, %v2252_v36  ;;  %v2255_v38 = vmax.f32 %v2141_v37, 0.0  ;;  %v2136_v39 = vadd.f32 %v3626_v55, %v2135_v2 }
 0x346   : > { %v3021_v40 = vpop.f32.mrf.mxu0 }
 0x347   : > { %2287 = vst.msk [vmem:[%s3633_s25 + $0x58] sm:$0xff] %vm829_vm1, %v2255_v38  ;;  %v2254_v41 = vmax.f32 %v2136_v39, 0.0  ;;  %v2151_v42 = vadd.f32 %v3021_v40, %v3626_v55 }
 0x348   : > { %v2145_v43 = vpop.f32.mrf.mxu0 }
 0x349   : > { %2286 = vst.msk [vmem:[%s3633_s25 + $0x50] sm:$0xff] %vm829_vm1, %v2254_v41  ;;  %v2257_v44 = vmax.f32 %v2151_v42, 0.0  ;;  %v2146_v51 = vadd.f32 %v3626_v55, %v2145_v43 }
 0x34a   : > { %v3024_v45 = vpop.f32.mrf.mxu0 }
 0x34b   : > { %2289 = vst.msk [vmem:[%s3633_s25 + $0x68] sm:$0xff] %vm829_vm1, %v2257_v44  ;;  %v2256_v53 = vmax.f32 %v2146_v51, 0.0  ;;  %v2161_v54 = vadd.f32 %v3024_v45, %v3626_v55 }
 0x34c   : > { %v2155_v57 = vpop.f32.mrf.mxu0 }
 0x34d   : > { %2288 = vst.msk [vmem:[%s3633_s25 + $0x60] sm:$0xff] %vm829_vm1, %v2256_v53  ;;  %v2259_v46 = vmax.f32 %v2161_v54, 0.0  ;;  %v2156_v58 = vadd.f32 %v3626_v55, %v2155_v57 }
 0x34e   : > { %v3027_v59 = vpop.f32.mrf.mxu0 }
 0x34f   : > { %2291 = vst.msk [vmem:[%s3633_s25 + $0x78] sm:$0xff] %vm829_vm1, %v2259_v46  ;;  %v2258_v60 = vmax.f32 %v2156_v58, 0.0  ;;  %v2171_v61 = vadd.f32 %v3027_v59, %v3626_v55 }
 0x350   : > { %v2165_v47 = vpop.f32.mrf.mxu0 }
 0x351   : > { %2290 = vst.msk [vmem:[%s3633_s25 + $0x70] sm:$0xff] %vm829_vm1, %v2258_v60  ;;  %v2261_v62 = vmax.f32 %v2171_v61, 0.0  ;;  %v2166_v56 = vadd.f32 %v3626_v55, %v2165_v47 }
 0x352   : > { %v3030_v0 = vpop.f32.mrf.mxu0 }
 0x353   : > { %2293 = vst.msk [vmem:[%s3633_s25 + $0x88] sm:$0xff] %vm829_vm1, %v2261_v62  ;;  %v2260_v48 = vmax.f32 %v2166_v56, 0.0  ;;  %v2181_v3 = vadd.f32 %v3030_v0, %v3626_v55 }
 0x354   : > { %v2175_v4 = vpop.f32.mrf.mxu0 }
 0x355   : > { %2292 = vst.msk [vmem:[%s3633_s25 + $0x80] sm:$0xff] %vm829_vm1, %v2260_v48  ;;  %v2263_v1 = vmax.f32 %v2181_v3, 0.0  ;;  %v2176_v5 = vadd.f32 %v3626_v55, %v2175_v4 }
 0x356   : > { %v3033_v50 = vpop.f32.mrf.mxu0 }
 0x357   : > { %2295 = vst.msk [vmem:[%s3633_s25 + $0x98] sm:$0xff] %vm829_vm1, %v2263_v1  ;;  %v2262_v6 = vmax.f32 %v2176_v5, 0.0  ;;  %v2191_v7 = vadd.f32 %v3033_v50, %v3626_v55 }
 0x358   : > { %v2185_v9 = vpop.f32.mrf.mxu0 }
 0x359   : > { %2294 = vst.msk [vmem:[%s3633_s25 + $0x90] sm:$0xff] %vm829_vm1, %v2262_v6  ;;  %v2265_v10 = vmax.f32 %v2191_v7, 0.0  ;;  %v2186_v11 = vadd.f32 %v3626_v55, %v2185_v9 }
 0x35a   : > { %v3036_v52 = vpop.f32.mrf.mxu0 }
 0x35b   : > { %2297 = vst.msk [vmem:[%s3633_s25 + $0xa8] sm:$0xff] %vm829_vm1, %v2265_v10  ;;  %v2264_v12 = vmax.f32 %v2186_v11, 0.0  ;;  %v2201_v13 = vadd.f32 %v3036_v52, %v3626_v55 }
 0x35c   : > { %v2195_v63 = vpop.f32.mrf.mxu0 }
 0x35d   : > { %2296 = vst.msk [vmem:[%s3633_s25 + $0xa0] sm:$0xff] %vm829_vm1, %v2264_v12  ;;  %v2267_v14 = vmax.f32 %v2201_v13, 0.0  ;;  %v2196_v15 = vadd.f32 %v3626_v55, %v2195_v63 }
 0x35e   : > { %v3039_v16 = vpop.f32.mrf.mxu0 }
 0x35f   : > { %2299 = vst.msk [vmem:[%s3633_s25 + $0xb8] sm:$0xff] %vm829_vm1, %v2267_v14  ;;  %v2266_v18 = vmax.f32 %v2196_v15, 0.0  ;;  %v2211_v8 = vadd.f32 %v3039_v16, %v3626_v55 }
 0x360   : > { %v2205_v19 = vpop.f32.mrf.mxu0 }
 0x361   : > { %2298 = vst.msk [vmem:[%s3633_s25 + $0xb0] sm:$0xff] %vm829_vm1, %v2266_v18  ;;  %v2269_v20 = vmax.f32 %v2211_v8, 0.0  ;;  %v2206_v21 = vadd.f32 %v3626_v55, %v2205_v19 }
 0x362   : > { %v3042_v22 = vpop.f32.mrf.mxu0 }
 0x363   : > { %2301 = vst.msk [vmem:[%s3633_s25 + $0xc8] sm:$0xff] %vm829_vm1, %v2269_v20  ;;  %v2268_v23 = vmax.f32 %v2206_v21, 0.0  ;;  %v2221_v17 = vadd.f32 %v3042_v22, %v3626_v55 }
 0x364   : > { %v2215_v24 = vpop.f32.mrf.mxu0 }
 0x365   : > { %2300 = vst.msk [vmem:[%s3633_s25 + $0xc0] sm:$0xff] %vm829_vm1, %v2268_v23  ;;  %v2271_v25 = vmax.f32 %v2221_v17, 0.0  ;;  %v2216_v49 = vadd.f32 %v3626_v55, %v2215_v24 }
 0x366   : > { %v3045_v26 = vpop.f32.mrf.mxu0 }
 0x367   : > { %2303 = vst.msk [vmem:[%s3633_s25 + $0xd8] sm:$0xff] %vm829_vm1, %v2271_v25  ;;  %v2270_v27 = vmax.f32 %v2216_v49, 0.0  ;;  %v2231_v28 = vadd.f32 %v3045_v26, %v3626_v55 }
 0x368   : > { %v2225_v29 = vpop.f32.mrf.mxu0 }
 0x369   : > { %2302 = vst.msk [vmem:[%s3633_s25 + $0xd0] sm:$0xff] %vm829_vm1, %v2270_v27  ;;  %v2273_v30 = vmax.f32 %v2231_v28, 0.0  ;;  %v2226_v31 = vadd.f32 %v3626_v55, %v2225_v29 }
 0x36a   : > { %v3048_v32 = vpop.f32.mrf.mxu0 }
 0x36b   : > { %2305 = vst.msk [vmem:[%s3633_s25 + $0xe8] sm:$0xff] %vm829_vm1, %v2273_v30  ;;  %v2272_v33 = vmax.f32 %v2226_v31, 0.0  ;;  %v2241_v34 = vadd.f32 %v3048_v32, %v3626_v55 }
 0x36c   : > { %v2235_v35 = vpop.f32.mrf.mxu0 }
 0x36d   : > { %2304 = vst.msk [vmem:[%s3633_s25 + $0xe0] sm:$0xff] %vm829_vm1, %v2272_v33  ;;  %v2275_v36 = vmax.f32 %v2241_v34, 0.0  ;;  %v2236_v37 = vadd.f32 %v3626_v55, %v2235_v35 }
 0x36f   : > { %2307 = vst.msk [vmem:[%s3633_s25 + $0xf8] sm:$0xff] %vm829_vm1, %v2275_v36  ;;  %v2274_v2 = vmax.f32 %v2236_v37, 0.0 }
 0x371   : > { %2306 = vst.msk [vmem:[%s3633_s25 + $0xf0] sm:$0xff] %vm829_vm1, %v2274_v2 }
 0x372 PF: > { %s20_s13 = sadd.s32 1, %s3071_s13  }
 0x373   : > { %p17_p4 = scmp.ge.s32.totalorder %s20_s13, 4  }
 0x375   :  { %19 = sbr.rel (!%p17_p4) target bundleno = 1 (0x1), region = 93 }

</bundles_post_ra>
